<compile_context>
chip_gen: v6e
topology: v6e:2x2x1
jax: 0.10.0
libtpu: 0.0.40
codegen_flags: <defaults>
</compile_context>

<pallas_src>
import functools

import jax
import jax.numpy as jnp
import numpy as np
from jax.experimental import pallas as pl
from jax.experimental.pallas import tpu as pltpu


def _round_up(x, m):
    return ((x + m - 1) // m) * m


def _tpu_generation_info():
    """Returns (mxu_rows, vmem_capacity_bytes, n_tensorcores) with safe fallbacks."""
    mxu_rows, vmem_cap, n_cores = 256, 128 * 1024 * 1024, 1
    try:
        kind = jax.devices()[0].device_kind.lower()
        if ("v5 lite" in kind) or ("v5e" in kind) or ("v5lite" in kind):
            mxu_rows = 128          # v5e MXU tile is 128x128
        if "v7" in kind:
            n_cores = 2             # v7x: 2 TensorCores per chip
    except Exception:
        pass
    try:
        vmem_cap = int(pltpu.get_tpu_info().vmem_capacity_bytes)
    except Exception:
        pass
    return mxu_rows, vmem_cap, n_cores


# ----------------------------------------------------------------------------
# Pallas kernel: one (batch tile, lane chunk) step of the packed Gram
# ----------------------------------------------------------------------------
def _cost_kernel(sign_ref, diagw_ref, img_ref, pv_ref, o_ref, x_ref, acc_ref,
                 *, tb, rows_pv, m, m8):
    k = pl.program_id(1)

    @pl.when(k == 0)
    def _():
        acc_ref[...] = jnp.zeros_like(acc_ref)

    # Assemble the packed chunk X = [images_tile ; pv_tile] in VMEM
    # (two cheap VMEM copies; the inputs come straight from HBM untouched).
    x_ref[pl.ds(0, tb), :] = img_ref[...]
    x_ref[pl.ds(tb, rows_pv), :] = pv_ref[...]
    if m8 > m:  # static: keep pad rows zero so garbage never reaches the Gram
        x_ref[pl.ds(m, m8 - m), :] = jnp.zeros((m8 - m, x_ref.shape[1]), jnp.float32)

    x = x_ref[...]
    # Single fused Gram: G += X X^T (contract the lane dim of both operands ->
    # MXU-native A.B^T, no transpose through the XLU).
    acc_ref[...] += jax.lax.dot_general(
        x, x, (((1,), (1,)), ((), ())), preferred_element_type=jnp.float32)

    @pl.when(k == pl.num_programs(1) - 1)
    def _():
        g = acc_ref[...]
        # Fused masked reduction with VMEM-resident constants:
        #   sum_b ( nsi^2 - 2*||ipv||^2 + ||ppt||^2 )
        # + 2*noise_var * sum_b ( trace(ppt) - nsi )
        # (all unscaled; the single 1/L^4 factor is applied in the wrapper).
        val = jnp.sum(g * (sign_ref[...] * g + diagw_ref[...]))
        o_ref[...] = jnp.full(o_ref.shape, val, dtype=o_ref.dtype)


def covar_cost_pallas(projected_vols, images_flat, L, noise_var):
    """projected_vols: (B, R, N); images_flat: (B, N).
    Returns sum_b cost_b (without the (noise_var/L)^2 constant and without /B)."""
    B, R, N = projected_vols.shape

    mxu_rows, vmem_cap, n_cores = _tpu_generation_info()
    # Generation-aware budgets: ~16 MiB working set / 40 MiB limit on v7x
    # (64 MiB VMEM); 24 MiB / 48 MiB on v5e / v6e (128 MiB VMEM).
    vmem_budget = min(vmem_cap // 4, 24 * 1024 * 1024)
    vmem_limit = min(vmem_cap * 5 // 8, 48 * 1024 * 1024)

    # ---- batch tile (rows of the packed Gram) -------------------------------
    rp1 = R + 1
    tb = max(1, min(B, max(1, mxu_rows // rp1)))
    if tb < B:
        tb = max(8, (tb // 8) * 8)          # block dims must be 8-aligned when tiled
    num_tiles = pl.cdiv(B, tb)
    if n_cores > 1 and num_tiles > 1 and num_tiles % 2 == 1:
        # v7x: prefer an even tile count so both TensorCores get equal work.
        tb_alt = max(8, _round_up(pl.cdiv(B, num_tiles + 1), 8))
        if pl.cdiv(B, tb_alt) % 2 == 0:
            tb = tb_alt
            num_tiles = pl.cdiv(B, tb)
    b_pad = num_tiles * tb

    rows_pv = tb * R
    m = tb + rows_pv                         # used rows of the packed tile
    m8 = _round_up(m, 8)

    # ---- lane (contraction) chunking ----------------------------------------
    n128 = _round_up(N, 128)
    fixed_bytes = 2 * (2 * m8 * m8 * 4) + m8 * m8 * 4        # resident consts + acc
    per_lane_bytes = 4 * (m8 + 2 * tb + 2 * rows_pv)         # X scratch + 2x-buffered inputs
    nk = max(128, min(n128, 4096, (vmem_budget - fixed_bytes) // per_lane_bytes))
    nk = (nk // 128) * 128
    k_chunks = pl.cdiv(n128, nk)
    nk = _round_up(pl.cdiv(n128, k_chunks), 128)             # rebalance chunks
    n_tot = k_chunks * nk

    imgs = images_flat.astype(jnp.float32)
    pvf = projected_vols.astype(jnp.float32).reshape(B * R, N)   # free reshape
    # Zero-pad only when required (no extra HBM traffic in the divisible case).
    if b_pad != B or n_tot != N:
        imgs = jnp.pad(imgs, ((0, b_pad - B), (0, n_tot - N)))
        pvf = jnp.pad(pvf, ((0, (b_pad - B) * R), (0, n_tot - N)))

    # ---- hoisted, VMEM-resident mask constants ------------------------------
    # Row layout of the packed tile: [0, tb) image rows, [tb, m) pv rows, pad after.
    w = np.zeros(m8, np.float32)
    w[:tb] = 1.0
    w[tb:m] = -1.0
    bid = np.full(m8, -1, np.int64)
    bid[:tb] = np.arange(tb)
    bid[tb:m] = np.arange(rows_pv) // R
    same = (bid[:, None] == bid[None, :]) & (bid[:, None] >= 0)
    sign_np = np.where(same, w[:, None] * w[None, :], 0.0).astype(np.float32)
    diag_np = np.diag(-w).astype(np.float32)
    sign = jnp.asarray(sign_np)
    # noise_var enters as a traced value -> no recompile when it changes.
    diagw = 2.0 * jnp.asarray(noise_var, jnp.float32) * jnp.asarray(diag_np)

    kernel = functools.partial(_cost_kernel, tb=tb, rows_pv=rows_pv, m=m, m8=m8)

    partials = pl.pallas_call(
        kernel,
        out_shape=jax.ShapeDtypeStruct((num_tiles, 8, 128), jnp.float32),
        grid_spec=pltpu.PrefetchScalarGridSpec(
            num_scalar_prefetch=0,
            grid=(num_tiles, k_chunks),
            in_specs=[
                pl.BlockSpec((m8, m8), lambda t, k: (0, 0)),       # sign (resident)
                pl.BlockSpec((m8, m8), lambda t, k: (0, 0)),       # diag weight (resident)
                pl.BlockSpec((tb, nk), lambda t, k: (t, k)),       # images tile
                pl.BlockSpec((tb * R, nk), lambda t, k: (t, k)),   # projected vols tile
            ],
            out_specs=pl.BlockSpec((1, 8, 128), lambda t, k: (t, 0, 0)),
            scratch_shapes=[
                pltpu.VMEM((m8, nk), jnp.float32),     # packed X chunk
                pltpu.VMEM((m8, m8), jnp.float32),     # Gram accumulator
            ],
        ),
        compiler_params=pltpu.CompilerParams(
            dimension_semantics=("parallel", "arbitrary"),
            vmem_limit_bytes=int(vmem_limit),
        ),
    )(sign, diagw, imgs, pvf)

    return jnp.sum(partials[:, 0, 0]) * (1.0 / float(L) ** 4)


def covar_cost(projected_vols, images_flat, vols, noise_var, reg):
    B = projected_vols.shape[0]
    R = vols.shape[0]
    L = vols.shape[-1]
    raw_sum = covar_cost_pallas(projected_vols, images_flat, L, noise_var)
    cost_val = raw_sum / B + (noise_var / L) ** 2        # per-batch constant term
    if reg != 0.0:
        # Regularization Gram in plain JAX (tiny matmul; keeps (R, L^3) out of VMEM).
        v = vols.reshape(R, -1).astype(jnp.float32) / (L ** 1.5)
        vp = jnp.dot(v, v.T)
        cost_val = cost_val + reg * jnp.sum(vp * vp)
    return cost_val


# ----------------------------------------------------------------------------
# Glue: stand-in for vol_forward (NUFFT projection is external / unavailable)
# ----------------------------------------------------------------------------
def vol_forward_approx(vols, nufft_plans, filters):
    # TODO(synk): real vol_forward uses per-image NUFFT plans (3D rotation + Fourier
    # projection + CTF); here we use an axis-1 line projection + real-space filter.
    del nufft_plans
    proj = jnp.sum(vols, axis=1)                              # (R, L, L)
    return filters[:, None, :, :] * proj[None, :, :, :]       # (B, R, L, L)


def covar_forward(vectors, images, nufft_plans, filters, noise_var, reg):
    """Equivalent of Covar.forward -> (cost_val, vectors)."""
    B = images.shape[0]
    R, L = vectors.shape[0], vectors.shape[-1]
    projected = vol_forward_approx(vectors, nufft_plans, filters)      # (B,R,L,L)
    pv = projected.reshape(B, R, L * L)
    cost_val = covar_cost(pv, images.reshape(B, L * L), vectors, noise_var, reg)
    return cost_val, vectors


# ----------------------------------------------------------------------------
# Pure-JAX reference for the cost formula (mirrors the PyTorch code)
# ----------------------------------------------------------------------------
def cost_ref(vols, images, projected_vols, noise_var, reg):
    B = images.shape[0]
    R = vols.shape[0]
    L = vols.shape[-1]
    imgs = images.reshape(B, 1, -1) / L
    pv = projected_vols.reshape(B, R, -1) / L
    nv = noise_var / L ** 2
    nsi = jnp.sum(imgs ** 2, axis=(1, 2))
    ipv = jnp.einsum('brn,bkn->brk', pv, imgs)
    ppt = jnp.einsum('brn,bsn->brs', pv, pv)
    cost_val = nsi ** 2 - 2 * jnp.sum(ipv ** 2, axis=(1, 2)) + jnp.sum(ppt ** 2, axis=(1, 2))
    nspv = jnp.trace(ppt, axis1=1, axis2=2)
    cost_val = cost_val + 2 * nv * (nspv - nsi) + (nv * L) ** 2
    cost_val = jnp.mean(cost_val, axis=0)
    if reg != 0:
        v = vols.reshape(R, -1) / L ** 1.5
        vp = v @ v.T
        cost_val = cost_val + reg * jnp.sum(vp ** 2)
    return cost_val


if __name__ == "__main__":
    resolution = 16      # L
    rank = 4
    batch = 2
    noise_var = 0.1
    reg = 1.0

    key = jax.random.PRNGKey(0)
    k_vec, k_img, k_flt = jax.random.split(key, 3)

    # Covar.__init__: vectors = randn(rank, L, L, L) / resolution
    vectors = (jax.random.normal(k_vec, (rank, resolution, resolution, resolution),
                                 dtype=jnp.float32) / resolution)
    images = jax.random.normal(k_img, (batch, resolution, resolution), dtype=jnp.float32)
    filters = jax.random.normal(k_flt, (batch, resolution, resolution), dtype=jnp.float32)
    nufft_plans = None   # external NUFFT plans unavailable; see TODO(synk) above

    cost_val, vecs_out = covar_forward(vectors, images, nufft_plans, filters,
                                       noise_var, reg)
    cost_val = jax.block_until_ready(cost_val)
    vecs_out = jax.block_until_ready(vecs_out)

    # Cross-check kernel against pure-JAX reference of the same formula.
    projected = vol_forward_approx(vectors, nufft_plans, filters)
    ref = jax.block_until_ready(cost_ref(vectors, images, projected, noise_var, reg))
    np.testing.assert_allclose(np.asarray(cost_val), np.asarray(ref),
                               rtol=1e-2, atol=1e-2)

    print("KERNEL_OK")
</pallas_src>

<mosaic_0001>
module attributes {stable_mosaic.version = 11 : i64} {
  func.func @_cost_kernel(%arg0: i32, %arg1: i32, %arg2: memref<16x16xf32, #tpu.memory_space<vmem>>, %arg3: memref<16x16xf32, #tpu.memory_space<vmem>>, %arg4: memref<2x256xf32, #tpu.memory_space<vmem>>, %arg5: memref<8x256xf32, #tpu.memory_space<vmem>>, %arg6: memref<1x8x128xf32, #tpu.memory_space<vmem>>, %arg7: memref<16x256xf32, #tpu.memory_space<vmem>>, %arg8: memref<16x16xf32, #tpu.memory_space<vmem>>) attributes {dimension_semantics = [#tpu.dimension_semantics<parallel>, #tpu.dimension_semantics<arbitrary>], iteration_bounds = array<i64: 1, 1>, scalar_prefetch = 0 : i64, scratch_operands = 2 : i64, tpu.core_type = #tpu.core_type<tc>, window_params = [{pipeline_mode = #tpu.pipeline_mode<synchronous>, transform_indices = @transform_0, window_bounds = array<i64: 16, 16>}, {pipeline_mode = #tpu.pipeline_mode<synchronous>, transform_indices = @transform_1, window_bounds = array<i64: 16, 16>}, {transform_indices = @transform_2, window_bounds = array<i64: 2, 256>}, {transform_indices = @transform_3, window_bounds = array<i64: 8, 256>}, {transform_indices = @transform_4, window_bounds = array<i64: 1, 8, 128>}]} {
    %c0_i32 = arith.constant 0 : i32
    %0 = arith.cmpi eq, %arg1, %c0_i32 : i32
    %1 = arith.extui %0 : i1 to i32
    %c0_i32_0 = arith.constant 0 : i32
    %2 = arith.cmpi ne, %1, %c0_i32_0 : i32
    scf.if %2 {
      %cst_17 = arith.constant 0.000000e+00 : f32
      %17 = vector.broadcast %cst_17 : f32 to vector<16x16xf32>
      %c0_18 = arith.constant 0 : index
      %c0_19 = arith.constant 0 : index
      %18 = vector.load %arg8[%c0_18, %c0_19] : memref<16x16xf32, #tpu.memory_space<vmem>>, vector<16x16xf32>
      tpu.vector_store %arg8[%c0_18, %c0_19], %17 {strides = array<i32>} : memref<16x16xf32, #tpu.memory_space<vmem>>, vector<16x16xf32>,
    } else {
    }
    %c0 = arith.constant 0 : index
    %c0_1 = arith.constant 0 : index
    %3 = vector.load %arg4[%c0, %c0_1] : memref<2x256xf32, #tpu.memory_space<vmem>>, vector<2x256xf32>
    %c0_2 = arith.constant 0 : index
    %c0_3 = arith.constant 0 : index
    %4 = vector.load %arg7[%c0_2, %c0_3] : memref<16x256xf32, #tpu.memory_space<vmem>>, vector<2x256xf32>
    tpu.vector_store %arg7[%c0_2, %c0_3], %3 {strides = array<i32>} : memref<16x256xf32, #tpu.memory_space<vmem>>, vector<2x256xf32>,
    %c0_4 = arith.constant 0 : index
    %c0_5 = arith.constant 0 : index
    %5 = vector.load %arg5[%c0_4, %c0_5] : memref<8x256xf32, #tpu.memory_space<vmem>>, vector<8x256xf32>
    %c2 = arith.constant 2 : index
    %c0_6 = arith.constant 0 : index
    %6 = vector.load %arg7[%c2, %c0_6] : memref<16x256xf32, #tpu.memory_space<vmem>>, vector<8x256xf32>
    tpu.vector_store %arg7[%c2, %c0_6], %5 {strides = array<i32>} : memref<16x256xf32, #tpu.memory_space<vmem>>, vector<8x256xf32>,
    %cst = arith.constant 0.000000e+00 : f32
    %7 = vector.broadcast %cst : f32 to vector<6x256xf32>
    %c10 = arith.constant 10 : index
    %c0_7 = arith.constant 0 : index
    %8 = vector.load %arg7[%c10, %c0_7] : memref<16x256xf32, #tpu.memory_space<vmem>>, vector<6x256xf32>
    tpu.vector_store %arg7[%c10, %c0_7], %7 {strides = array<i32>} : memref<16x256xf32, #tpu.memory_space<vmem>>, vector<6x256xf32>,
    %c0_8 = arith.constant 0 : index
    %c0_9 = arith.constant 0 : index
    %9 = vector.load %arg7[%c0_8, %c0_9] : memref<16x256xf32, #tpu.memory_space<vmem>>, vector<16x256xf32>
    %c0_10 = arith.constant 0 : index
    %c0_11 = arith.constant 0 : index
    %10 = vector.load %arg8[%c0_10, %c0_11] : memref<16x16xf32, #tpu.memory_space<vmem>>, vector<16x16xf32>
    %cst_12 = arith.constant dense<0.000000e+00> : vector<16x16xf32>
    %11 = tpu.matmul %9, %9, %cst_12 {dimension_numbers = #tpu.dot_dimension_numbers<[1], [1], [0], [0], [0, 0, 1, 0], [], []>} : vector<16x256xf32>, vector<16x256xf32>, vector<16x16xf32> -> vector<16x16xf32>
    %12 = arith.addf %10, %11 : vector<16x16xf32>
    %c0_13 = arith.constant 0 : index
    %c0_14 = arith.constant 0 : index
    %13 = vector.load %arg8[%c0_13, %c0_14] : memref<16x16xf32, #tpu.memory_space<vmem>>, vector<16x16xf32>
    tpu.vector_store %arg8[%c0_13, %c0_14], %12 {strides = array<i32>} : memref<16x16xf32, #tpu.memory_space<vmem>>, vector<16x16xf32>,
    %c0_i32_15 = arith.constant 0 : i32
    %14 = arith.cmpi eq, %arg1, %c0_i32_15 : i32
    %15 = arith.extui %14 : i1 to i32
    %c0_i32_16 = arith.constant 0 : i32
    %16 = arith.cmpi ne, %15, %c0_i32_16 : i32
    scf.if %16 {
      %c0_17 = arith.constant 0 : index
      %c0_18 = arith.constant 0 : index
      %17 = vector.load %arg8[%c0_17, %c0_18] : memref<16x16xf32, #tpu.memory_space<vmem>>, vector<16x16xf32>
      %c0_19 = arith.constant 0 : index
      %c0_20 = arith.constant 0 : index
      %18 = vector.load %arg2[%c0_19, %c0_20] : memref<16x16xf32, #tpu.memory_space<vmem>>, vector<16x16xf32>
      %19 = arith.mulf %18, %17 : vector<16x16xf32>
      %c0_21 = arith.constant 0 : index
      %c0_22 = arith.constant 0 : index
      %20 = vector.load %arg3[%c0_21, %c0_22] : memref<16x16xf32, #tpu.memory_space<vmem>>, vector<16x16xf32>
      %21 = arith.addf %19, %20 : vector<16x16xf32>
      %22 = arith.mulf %17, %21 : vector<16x16xf32>
      %23 = vector.shape_cast %22 : vector<16x16xf32> to vector<1x16x16xf32>
      %cst_23 = arith.constant dense<0.000000e+00> : vector<1xf32>
      %24 = vector.multi_reduction <add>, %23, %cst_23 [1, 2] : vector<1x16x16xf32> to vector<1xf32>
      %25 = vector.shape_cast %24 : vector<1xf32> to vector<1x1x1xf32>
      %26 = vector.extract %25[0, 0, 0] : f32 from vector<1x1x1xf32>
      %27 = vector.broadcast %26 : f32 to vector<1x8x128xf32>
      %c0_24 = arith.constant 0 : index
      %c0_25 = arith.constant 0 : index
      %c0_26 = arith.constant 0 : index
      %28 = vector.load %arg6[%c0_24, %c0_25, %c0_26] : memref<1x8x128xf32, #tpu.memory_space<vmem>>, vector<1x8x128xf32>
      tpu.vector_store %arg6[%c0_24, %c0_25, %c0_26], %27 {strides = array<i32>} : memref<1x8x128xf32, #tpu.memory_space<vmem>>, vector<1x8x128xf32>,
    } else {
    }
    return
  }
  func.func @transform_0(%arg0: i32, %arg1: i32) -> (i32, i32) {
    %c0_i32 = arith.constant 0 : i32
    %c0_i32_0 = arith.constant 0 : i32
    %c0_i32_1 = arith.constant 0 : i32
    return %c0_i32, %c0_i32_0 : i32, i32
  }
  func.func @transform_1(%arg0: i32, %arg1: i32) -> (i32, i32) {
    %c0_i32 = arith.constant 0 : i32
    %c0_i32_0 = arith.constant 0 : i32
    %c0_i32_1 = arith.constant 0 : i32
    return %c0_i32, %c0_i32_0 : i32, i32
  }
  func.func @transform_2(%arg0: i32, %arg1: i32) -> (i32, i32) {
    %c0_i32 = arith.constant 0 : i32
    return %arg0, %arg1 : i32, i32
  }
  func.func @transform_3(%arg0: i32, %arg1: i32) -> (i32, i32) {
    %c0_i32 = arith.constant 0 : i32
    return %arg0, %arg1 : i32, i32
  }
  func.func @transform_4(%arg0: i32, %arg1: i32) -> (i32, i32, i32) {
    %c0_i32 = arith.constant 0 : i32
    %c0_i32_0 = arith.constant 0 : i32
    %c0_i32_1 = arith.constant 0 : i32
    return %arg0, %c0_i32, %c0_i32_0 : i32, i32, i32
  }
}

</mosaic_0001>

<bundles_post_ra>
// kernel: tpu_custom_call.1
= control target key start
LH: loop header
LB: loop body
LE: loop exit
PB: predicated region body
PF: predicated region fallthrough
CT: control target
= control target key end

     0   :  { %9 = vsyncpa [#allocation5], 0  ;;  %s413_s0 = inlined_call_operand.hbm [shape: f32[16,16], index: 0, kind: input, shape index: {}]   ;;  %s414_s1 = inlined_call_operand.hbm [shape: f32[16,16], index: 1, kind: input, shape index: {}]   ;;  %s415_s2 = inlined_call_operand.hbm [shape: f32[2,256], index: 2, kind: input, shape index: {}]   ;;  %s416_s3 = inlined_call_operand.hbm [shape: f32[8,256], index: 3, kind: input, shape index: {}]   ;;  %s417_s4 = inlined_call_operand.hbm [shape: f32[1,8,128], index: 4, kind: output, shape index: {}]  }
   0x1   :  { %10 = vsyncpa [#allocation8], 0 }
   0x2   :  { %11 = vsyncpa [#allocation11], 0 }
   0x3   :  { %12 = vsyncpa [#allocation6], 0  ;;  %s359_s15 = smov [#allocation7]   ;;  %s360_s17 = smov [#allocation4]  }
   0x4   :  { %s30_s16 = sshll.u32 %s359_s15, 4  ;;  %s18_s18 = sshll.u32 %s360_s17, 4  ;;  %s31_s16 = int_to_ptr.vmem [resolvable:$true] %s30_s16  ;;  %s19_s18 = int_to_ptr.vmem [resolvable:$true] %s18_s18 }
   0x5   :  { %s259_s19 = scalar_lea.vmem %s31_s16, 256  ;;  %p264_p1 = scmp.lt.s32.totalorder %s31_s16, %s31_s16 }
   0x6   :  { %p260_p0 = scmp.ne.s32.totalorder %s31_s16, %s259_s19  ;;  %p265_p2 = scmp.lt.s32.totalorder %s259_s19, %s259_s19 }
   0x8   :  { %p266_p3 = por %p265_p2, %p264_p1 }
   0xa   :  { %p267_p4 = pnand %p266_p3, %p260_p0 }
   0xc   :  { %270 = shalt.err (!%p267_p4)
}
   0xd   :  { %s361_s20 = smov 128   ;;  %s362_s21 = smov 8  }
   0xe   :  { %36 = dma.hbm_to_vmem [thread:$0]  %s414_s1, 256, %s31_s16, [#allocation8], %s361_s20, %s361_s20, %s362_s21  }
   0xf   :  { %s279_s24 = scalar_lea.vmem %s19_s18, 256  ;;  %p284_p6 = scmp.lt.s32.totalorder %s19_s18, %s19_s18 }
  0x10   :  { %p280_p5 = scmp.ne.s32.totalorder %s19_s18, %s279_s24  ;;  %p285_p7 = scmp.lt.s32.totalorder %s279_s24, %s279_s24 }
  0x12   :  { %p286_p8 = por %p285_p7, %p284_p6 }
  0x14   :  { %p287_p9 = pnand %p286_p8, %p280_p5 }
  0x16   :  { %290 = shalt.err (!%p287_p9)
}
  0x17   :  { %24 = dma.hbm_to_vmem [thread:$0]  %s413_s0, 256, %s19_s18, [#allocation5], %s361_s20, %s361_s20, %s362_s21  }
  0x18   :  { %s363_s27 = smov [#allocation9]   ;;  %s364_s29 = smov [#allocation10]  }
  0x19   :  { %s43_s28 = sshll.u32 %s363_s27, 4  ;;  %s53_s30 = sshll.u32 %s364_s29, 4  ;;  %s44_s28 = int_to_ptr.vmem [resolvable:$true] %s43_s28  ;;  %s54_s30 = int_to_ptr.vmem [resolvable:$true] %s53_s30 }
  0x1a   :  { %s299_s5 = scalar_lea.vmem %s44_s28, 64  ;;  %p304_p11 = scmp.lt.s32.totalorder %s44_s28, %s44_s28 }
  0x1b   :  { %p300_p10 = scmp.ne.s32.totalorder %s44_s28, %s299_s5  ;;  %p305_p12 = scmp.lt.s32.totalorder %s299_s5, %s299_s5 }
  0x1d   :  { %p306_p13 = por %p305_p12, %p304_p11 }
  0x1f   :  { %p307_p0 = pnand %p306_p13, %p300_p10 }
  0x21   :  { %310 = shalt.err (!%p307_p0)
}
  0x22   :  { %46 = dma.hbm_to_vmem [thread:$0]  %s415_s2, 64, %s44_s28, [#allocation8]  }
  0x23   :  { %s319_s7 = scalar_lea.vmem %s54_s30, 256  ;;  %p324_p2 = scmp.lt.s32.totalorder %s54_s30, %s54_s30 }
  0x24   :  { %p320_p1 = scmp.ne.s32.totalorder %s54_s30, %s319_s7  ;;  %p325_p3 = scmp.lt.s32.totalorder %s319_s7, %s319_s7 }
  0x26   :  { %p326_p4 = por %p325_p3, %p324_p2 }
  0x28   :  { %p327_p5 = pnand %p326_p4, %p320_p1 }
  0x2a   :  { %330 = shalt.err (!%p327_p5)
}
  0x2b   :  { %56 = dma.hbm_to_vmem [thread:$0]  %s416_s3, 256, %s54_s30, [#allocation11]  }
  0x2c   :  { %351 = dma.done.wait [#allocation5], 256  }
  0x2d   :  { %352 = vsyncadd [#allocation5], 4294967040 }
  0x2e   :  { %353 = dma.done.wait [#allocation8], 320  }
  0x2f   :  { %354 = vsyncadd [#allocation8], 4294966976 }
  0x30   :  { %355 = dma.done.wait [#allocation11], 256  }
  0x31   :  { %356 = vsyncadd [#allocation11], 4294967040  ;;  %vm73_vm0 = vcmask 130048   ;;  %v365_v0 = vmov 0.0   ;;  %v91_v1 = vld [vmem:[#allocation10 + $0x8] sm:$0xff]  ;;  %v90_v2 = vld [vmem:[#allocation10] sm:$0xff] }
  0x32   :  { %103 = vst [vmem:[#allocation2 + $0x8] sm:$0xfc] %v365_v0  ;;  %102 = vst [vmem:[#allocation2 + $0x18] sm:$0xfc] %v365_v0  ;;  %v95_v4 = vrot.slane %v91_v1, 6  ;;  %v94_v5 = vrot.slane %v90_v2, 6 }
  0x33   :  { %74 = vst.msk [vmem:[#allocation3] sm:$0xff] %vm73_vm0, %v365_v0  ;;  %75 = vst.msk [vmem:[#allocation3 + $0x8] sm:$0xff] %vm73_vm0, %v365_v0  ;;  %v236_v3 = vld.sshfl [vmem:[#allocation9] sm:$0x33 pattern:$0x76325410] }
  0x34   :  { %v85_v6 = vcombine.high %v236_v3, %v236_v3  ;;  %88 = vst [vmem:[#allocation2 + $0x10] sm:$0x3] %v236_v3  ;;  %101 = vst [vmem:[#allocation2 + $0x8] sm:$0x3] %v95_v4  ;;  %v195_v19 = vld [vmem:[#allocation4] sm:$0xff]  ;;  %v196_v20 = vld [vmem:[#allocation4 + $0x8] sm:$0xff] }
  0x35   :  { %99 = vst [vmem:[#allocation2] sm:$0xfc] %v95_v4  ;;  %100 = vst [vmem:[#allocation2 + $0x18] sm:$0x3] %v94_v5  ;;  %v199_v21 = vld [vmem:[#allocation7] sm:$0xff]  ;;  %v200_v24 = vld [vmem:[#allocation7 + $0x8] sm:$0xff] }
  0x36   :  { %98 = vst [vmem:[#allocation2 + $0x10] sm:$0xfc] %v94_v5  ;;  %89 = vst [vmem:[#allocation2] sm:$0x3] %v85_v6  ;;  %s366_s2 = smov [#allocation12]  }
  0x37   :  { %s225_s3 = sshll.u32 %s366_s2, 4  ;;  %s226_s3 = int_to_ptr.vmem [resolvable:$true] %s225_s3 }
  0x38   :  { %s331_s10 = scalar_lea.vmem %s226_s3, 128  ;;  %p336_p7 = scmp.lt.s32.totalorder %s226_s3, %s226_s3 }
  0x39   :  { %p332_p6 = scmp.ne.s32.totalorder %s226_s3, %s331_s10  ;;  %p337_p8 = scmp.lt.s32.totalorder %s331_s10, %s331_s10 }
  0x3a   :  { %v108_v11 = vld [vmem:[#allocation3] sm:$0xff]  ;;  %v109_v12 = vld [vmem:[#allocation3 + $0x8] sm:$0xff] }
  0x3b   :  { %v107_v7 = vld [vmem:[#allocation2 + $0x8] sm:$0xff]  ;;  %p338_p9 = por %p337_p8, %p336_p7 }
  0x3c   :  { %v106_v8 = vld [vmem:[#allocation2 + $0x18] sm:$0xff]  ;;  %138 = vmatprep.subr.mxu0 %v107_v7  ;;  %237 = vmatprep.subr.mxu1 %v107_v7 }
  0x3d   :  { %v105_v9 = vld [vmem:[#allocation2] sm:$0xff]  ;;  %139 = vmatpush1.xpose.msra.mxu0 %v106_v8  ;;  %239 = vmatpush1.xpose.msra.mxu1 %v106_v8  ;;  %v104_v10 = vld [vmem:[#allocation2 + $0x10] sm:$0xff]  ;;  %p339_p10 = pnand %p338_p9, %p332_p6 }
  0x3e   :  { %140 = vmatprep.subr.mxu0 %v105_v9  ;;  %238 = vmatprep.subr.mxu1 %v105_v9 }
  0x3f   :  { %174 = vmatprep.mubr.f32.mxu0 %v105_v9  ;;  %179 = vmatprep.mubr.f32.mxu1 %v107_v7 }
  0x41   :  { %141 = vmatpush1.xpose.msra.mxu0 %v104_v10  ;;  %240 = vmatpush1.xpose.msra.mxu1 %v104_v10 }
  0x44   :  { %175 = vmatmul.mubr.f32.vlgmr.msra.gmra.mxu0 %v104_v10  ;;  %180 = vmatmul.mubr.f32.vlgmr.msra.gmra.mxu1 %v106_v8 }
 0x104   :  { %v176_v13 = vpop.f32.mrf.mxu0  ;;  %v181_v14 = vpop.f32.mrf.mxu1 }
 0x105   :  { %v185_v15 = vadd.f32 %v176_v13, %v108_v11  ;;  %v186_v16 = vadd.f32 %v181_v14, %v109_v12 }
 0x106   :  { %v178_v17 = vpop.f32.mrf.mxu0  ;;  %v183_v18 = vpop.f32.mrf.mxu1 }
 0x107   :  { %188 = vst.msk [vmem:[#allocation3] sm:$0xff] %vm73_vm0, %v185_v15  ;;  %189 = vst.msk [vmem:[#allocation3 + $0x8] sm:$0xff] %vm73_vm0, %v186_v16 }
 0x10e   :  { %v193_v22 = vld [vmem:[#allocation3] sm:$0xff]  ;;  %v194_v23 = vld [vmem:[#allocation3 + $0x8] sm:$0xff] }
 0x10f   :  { %v197_v25 = vmul.f32 %v195_v19, %v193_v22  ;;  %v198_v26 = vmul.f32 %v196_v20, %v194_v23 }
 0x111   :  { %v201_v27 = vadd.f32 %v199_v21, %v197_v25  ;;  %v202_v28 = vadd.f32 %v200_v24, %v198_v26 }
 0x113   :  { %v203_v29 = vmul.f32 %v201_v27, %v193_v22  ;;  %v204_v30 = vmul.f32 %v202_v28, %v194_v23 }
 0x115   :  { %v205_v31 = vsel %vm73_vm0, %v203_v29, 0.0  ;;  %v206_v32 = vsel %vm73_vm0, %v204_v30, 0.0 }
 0x116   :  { %v207_v33 = vadd.f32 %v206_v32, %v205_v31 }
 0x118   :  { %208 = vadd.xlane.f32.xlu0 %v207_v33 }
 0x1a1   :  { %v209_v34 = vpop.xlane.xlu0 %208 }
 0x1a2   :  { %v210_v35 = vrot.slane %v209_v34, 4 }
 0x1a4   :  { %v211_v36 = vadd.f32 %v210_v35, %v209_v34 }
 0x1a6   :  { %v212_v37 = vrot.slane %v211_v36, 2 }
 0x1a8   :  { %v213_v38 = vadd.f32 %v212_v37, %v211_v36 }
 0x1aa   :  { %v214_v39 = vrot.slane %v213_v38, 1 }
 0x1ac   :  { %v215_v40 = vadd.f32 %v214_v39, %v213_v38 }
 0x1ae   :  { %241 = vpush %v215_v40 }
 0x1df   :  { %s242_s9 = spop %241 }
 0x1e0   :  { %v217_v41 = vstv %s242_s9 }
 0x1e1   :  { %218 = vst [vmem:[#allocation12] sm:$0xff] %v217_v41 }
 0x1e2   :  { %342 = shalt.err (!%p339_p10)
}
 0x1e3   :  { %228 = dma.vmem_to_hbm [thread:$0]  %s226_s3, 128, %s417_s4, [#allocation6]  }
 0x1e4   :  { %357 = dma.done.wait [#allocation6], 128  }
 0x1e5   :  { %358 = vsyncadd [#allocation6], 4294967168 }
 0x1e6   :  { %232 = vsyncpa [#allocation5], 1 }
 0x1e7   :  { %233 = vsyncpa [#allocation8], 1 }
 0x1e8   :  { %234 = vsyncpa [#allocation11], 1 }
 0x1e9   :  { %235 = vsyncpa [#allocation6], 1 }

</bundles_post_ra>
